<compile_context>
chip_gen: v5e
topology: v5e:2x2
jax: 0.10.0
libtpu: 0.0.40
codegen_flags: <defaults>
</compile_context>

<pallas_src>
import functools

import jax
import jax.numpy as jnp
from jax.experimental import pallas as pl
from jax.experimental.pallas import tpu as pltpu


def _fused_fc_kernel(x_ref, slab_ref, shifts_ref, o_ref, *, k, n1):
    # x_ref:      (B, K)       bf16 input activations
    # slab_ref:   (N1+K, N2)   bf16: rows [0:N1]    = w2' (scale-folded, (N1,N2))
    #                                 rows [N1:N1+K] lanes [0:N1] = w1' ((K,N1))
    # shifts_ref: (2, N2)      f32:  row 0 lanes [0:N1] = shift1, row 1 = shift2
    # o_ref:      (B, N2)      f32 output
    w2 = slab_ref[0:n1, :]              # (N1, N2) bf16, tile-aligned slice
    w1 = slab_ref[n1:n1 + k, 0:n1]      # (K, N1)  bf16, tile-aligned slice

    # Layer 1: Linear (+ folded BN) + ReLU.  Dropout: identity in eval mode.
    h = jnp.dot(x_ref[...], w1, preferred_element_type=jnp.float32)
    h = jnp.maximum(h + shifts_ref[0:1, 0:n1], 0.0)

    # Layer 2: Linear (+ folded BN) + ReLU.  Dropout: identity in eval mode.
    h = jnp.dot(h.astype(slab_ref.dtype), w2, preferred_element_type=jnp.float32)
    h = jnp.maximum(h + shifts_ref[1:2, :], 0.0)

    o_ref[...] = h.astype(o_ref.dtype)


def fused_fclayers(x_bf16, slab, shifts):
    """Fused 2-layer (Linear + folded-BN + ReLU [+ eval Dropout]) forward.

    x_bf16: (B, K)        bfloat16
    slab:   (N1+K, N2)    bfloat16  packed scale-folded weights (see kernel)
    shifts: (2, N2)       float32   packed per-layer effective shifts
    """
    B, K = x_bf16.shape
    rows, N2 = slab.shape
    N1 = rows - K
    assert N1 > 0 and shifts.shape == (2, N2)

    kernel = functools.partial(_fused_fc_kernel, k=K, n1=N1)
    return pl.pallas_call(
        kernel,
        out_shape=jax.ShapeDtypeStruct((B, N2), jnp.float32),
        # No grid: single invocation, whole operands resident in VMEM — no
        # grid-loop / pipelining scaffolding for a kernel that cannot pipeline.
        in_specs=[
            pl.BlockSpec(memory_space=pltpu.MemorySpace.VMEM),  # x
            pl.BlockSpec(memory_space=pltpu.MemorySpace.VMEM),  # weight slab
            pl.BlockSpec(memory_space=pltpu.MemorySpace.VMEM),  # shifts
        ],
        out_specs=pl.BlockSpec(memory_space=pltpu.MemorySpace.VMEM),
    )(x_bf16, slab, shifts)


def init_fc_layers(key, in_features, hidden_sizes):
    """Deterministic params mimicking nn.Linear / nn.BatchNorm1d (eval mode)."""
    raw_params = []
    f_in = in_features
    for f_out in hidden_sizes:
        key, kw, kb, kg, kbeta = jax.random.split(key, 5)
        bound = 1.0 / jnp.sqrt(f_in)
        w = jax.random.uniform(kw, (f_out, f_in), jnp.float32, -bound, bound)
        b = jax.random.uniform(kb, (f_out,), jnp.float32, -bound, bound)
        # BatchNorm1d affine params; running stats at PyTorch defaults.
        gamma = 1.0 + 0.1 * jax.random.normal(kg, (f_out,), jnp.float32)
        beta = 0.1 * jax.random.normal(kbeta, (f_out,), jnp.float32)
        running_mean = jnp.zeros((f_out,), jnp.float32)
        running_var = jnp.ones((f_out,), jnp.float32)
        eps = 1e-5
        scale = gamma / jnp.sqrt(running_var + eps)
        shift = beta - running_mean * scale
        raw_params.append((w.T, b, scale, shift))  # w stored (in, out)
        f_in = f_out
    return raw_params


def pack_kernel_params(raw_params):
    """Host-side, call-invariant packing: fold BN scale into W, bias into shift,
    pack both weight matrices into one bf16 slab and both shifts into one f32
    (2, N2) array."""
    (w1, b1, s1, sh1), (w2, b2, s2, sh2) = raw_params
    # (x @ W) * s == x @ (W * s)
    w1s = w1 * s1[None, :]                     # (K, N1)
    w2s = w2 * s2[None, :]                     # (N1, N2)
    shift1 = b1 * s1 + sh1                     # (N1,)
    shift2 = b2 * s2 + sh2                     # (N2,)

    K, N1 = w1s.shape
    N1b, N2 = w2s.shape
    assert N1 == N1b

    slab = jnp.zeros((N1 + K, N2), jnp.bfloat16)
    slab = slab.at[0:N1, :].set(w2s.astype(jnp.bfloat16))
    slab = slab.at[N1:N1 + K, 0:N1].set(w1s.astype(jnp.bfloat16))

    shifts = jnp.zeros((2, N2), jnp.float32)
    shifts = shifts.at[0, 0:N1].set(shift1)
    shifts = shifts.at[1, :].set(shift2)
    return slab, shifts


@jax.jit
def fclayers_forward(x, slab, shifts):
    # bf16 activations in, f32 out (f32 MXU accumulation inside the kernel).
    return fused_fclayers(x.astype(jnp.bfloat16), slab, shifts)


def reference_forward(x, raw_params):
    """Pure-JAX reference mirroring the kernel numerics (bf16 weights /
    activations, f32 accumulation, scale folded into W, bias into shift)."""
    h = x.astype(jnp.bfloat16).astype(jnp.float32)
    for i, (w, b, scale, shift) in enumerate(raw_params):
        if i > 0:
            h = h.astype(jnp.bfloat16).astype(jnp.float32)
        ws = (w * scale[None, :]).astype(jnp.bfloat16).astype(jnp.float32)
        eff_shift = b * scale + shift
        h = jnp.maximum(h @ ws + eff_shift, 0.0)
    return h


if __name__ == "__main__":
    key = jax.random.PRNGKey(0)
    B = 8                 # batch
    IN_FEATURES = 32
    HIDDEN = (128, 256)   # trial-suggested layer widths from n_units_list

    kx, kp = jax.random.split(key)
    x = jax.random.normal(kx, (B, IN_FEATURES), jnp.float32)
    raw_params = init_fc_layers(kp, IN_FEATURES, HIDDEN)
    slab, shifts = pack_kernel_params(raw_params)

    out = fclayers_forward(x, slab, shifts)
    out = jax.block_until_ready(out)

    ref = reference_forward(x, raw_params)
    assert out.shape == (B, HIDDEN[-1]), out.shape
    assert jnp.allclose(out, ref, atol=1e-3, rtol=1e-3), "mismatch vs reference"

    print("KERNEL_OK")
</pallas_src>

<mosaic_0001>
module attributes {stable_mosaic.version = 11 : i64} {
  func.func @_fused_fc_kernel(%arg0: memref<8x32xbf16, #tpu.memory_space<vmem>>, %arg1: memref<160x256xbf16, #tpu.memory_space<vmem>>, %arg2: memref<2x256xf32, #tpu.memory_space<vmem>>, %arg3: memref<8x256xf32, #tpu.memory_space<vmem>>) attributes {dimension_semantics = [], scalar_prefetch = 0 : i64, scratch_operands = 0 : i64, tpu.core_type = #tpu.core_type<tc>} {
    %c0 = arith.constant 0 : index
    %c0_0 = arith.constant 0 : index
    %0 = vector.load %arg1[%c0, %c0_0] : memref<160x256xbf16, #tpu.memory_space<vmem>>, vector<128x256xbf16>
    %c128 = arith.constant 128 : index
    %c0_1 = arith.constant 0 : index
    %1 = vector.load %arg1[%c128, %c0_1] : memref<160x256xbf16, #tpu.memory_space<vmem>>, vector<32x128xbf16>
    %c0_2 = arith.constant 0 : index
    %c0_3 = arith.constant 0 : index
    %2 = vector.load %arg0[%c0_2, %c0_3] : memref<8x32xbf16, #tpu.memory_space<vmem>>, vector<8x32xbf16>
    %cst = arith.constant dense<0.000000e+00> : vector<8x128xf32>
    %3 = tpu.matmul %2, %1, %cst {dimension_numbers = #tpu.dot_dimension_numbers<[1], [0], [0], [1], [0, 0, 1, 1], [], []>} : vector<8x32xbf16>, vector<32x128xbf16>, vector<8x128xf32> -> vector<8x128xf32>
    %c0_4 = arith.constant 0 : index
    %c0_5 = arith.constant 0 : index
    %4 = vector.load %arg2[%c0_4, %c0_5] : memref<2x256xf32, #tpu.memory_space<vmem>>, vector<1x128xf32>
    %5 = vector.broadcast %4 : vector<1x128xf32> to vector<8x128xf32>
    %6 = arith.addf %3, %5 : vector<8x128xf32>
    %cst_6 = arith.constant 0.000000e+00 : f32
    %7 = vector.broadcast %cst_6 : f32 to vector<8x128xf32>
    %8 = arith.maximumf %6, %7 : vector<8x128xf32>
    %9 = arith.truncf %8 : vector<8x128xf32> to vector<8x128xbf16>
    %cst_7 = arith.constant dense<0.000000e+00> : vector<8x256xf32>
    %10 = tpu.matmul %9, %0, %cst_7 {dimension_numbers = #tpu.dot_dimension_numbers<[1], [0], [0], [1], [0, 0, 1, 1], [], []>} : vector<8x128xbf16>, vector<128x256xbf16>, vector<8x256xf32> -> vector<8x256xf32>
    %c1 = arith.constant 1 : index
    %c0_8 = arith.constant 0 : index
    %11 = vector.load %arg2[%c1, %c0_8] : memref<2x256xf32, #tpu.memory_space<vmem>>, vector<1x256xf32>
    %12 = vector.broadcast %11 : vector<1x256xf32> to vector<8x256xf32>
    %13 = arith.addf %10, %12 : vector<8x256xf32>
    %cst_9 = arith.constant 0.000000e+00 : f32
    %14 = vector.broadcast %cst_9 : f32 to vector<8x256xf32>
    %15 = arith.maximumf %13, %14 : vector<8x256xf32>
    %c0_10 = arith.constant 0 : index
    %c0_11 = arith.constant 0 : index
    %16 = vector.load %arg3[%c0_10, %c0_11] : memref<8x256xf32, #tpu.memory_space<vmem>>, vector<8x256xf32>
    tpu.vector_store %arg3[%c0_10, %c0_11], %15 {strides = array<i32>} : memref<8x256xf32, #tpu.memory_space<vmem>>, vector<8x256xf32>,
    return
  }
}

</mosaic_0001>

<bundles_post_ra>
// kernel: fclayers_forward.1
= control target key start
LH: loop header
LB: loop body
LE: loop exit
PB: predicated region body
PF: predicated region fallthrough
CT: control target
= control target key end

     0   :  { %8 = vsyncpa [#allocation3], 0  ;;  %s408_s0 = inlined_call_operand.vmem [shape: bf16[8,32], index: 0, kind: input, shape index: {}]   ;;  %s409_s1 = inlined_call_operand.hbm [shape: bf16[160,256], index: 1, kind: input, shape index: {}]   ;;  %s410_s2 = inlined_call_operand.vmem [shape: f32[2,256], index: 2, kind: input, shape index: {}]   ;;  %s411_s3 = inlined_call_operand.hbm [shape: f32[8,256], index: 3, kind: output, shape index: {}]  }
   0x1   :  { %9 = vsyncpa [#allocation4], 0  ;;  %s16_s14 = sshll.u32 %s409_s1, 4  ;;  %s369_s15 = smov [#allocation2]   ;;  %s17_s14 = int_to_ptr.hbm [resolvable:$true] %s16_s14 }
   0x2   :  { %s18_s16 = sshll.u32 %s369_s15, 4  ;;  %s370_s17 = smov 128   ;;  %s19_s16 = int_to_ptr.vmem [resolvable:$true] %s18_s16 }
   0x3   :  { %s371_s18 = smov 8  }
   0x4   :  { %24 = dma.hbm_to_vmem [thread:$0]  %s17_s14, 2560, %s19_s16, [#allocation3], %s370_s17, %s370_s17, %s371_s18  }
   0x5   :  { %365 = dma.done.wait [#allocation3], 2560  }
   0x6   :  { %366 = vsyncadd [#allocation3], 4294964736  ;;  %v226_v0 = vld [vmem:[#allocation2 + $0x90] sm:$0xf]  ;;  %v311_v1 = vld [vmem:[#allocation2 + $0x94] sm:$0xf0] }
   0x7   :  { %v222_v2 = vld [vmem:[#allocation2 + $0x80] sm:$0xf]  ;;  %v227_v3 = vor.u32 %v311_v1, %v226_v0  ;;  %v310_v4 = vld [vmem:[#allocation2 + $0x84] sm:$0xf0]  ;;  %v288_v5 = vld [vmem:[#allocation2 + $0x70] sm:$0xf] }
   0x8   :  { %v309_v6 = vld [vmem:[#allocation2 + $0x74] sm:$0xf0]  ;;  %v308_v7 = vld [vmem:[#allocation2 + $0x74] sm:$0xf]  ;;  %v290_v8 = vld [vmem:[#allocation2 + $0x78] sm:$0xf0]  ;;  %v223_v9 = vor.u32 %v310_v4, %v222_v2 }
   0x9   :  { %77 = vmatpush.bf16.msra.mxu0 %v227_v3  ;;  %v289_v10 = vor.u32 %v309_v6, %v288_v5  ;;  %v293_v11 = vor.u32 %v308_v7, %v290_v8  ;;  %v280_v12 = vld [vmem:[#allocation2 + $0x60] sm:$0xf]  ;;  %v307_v13 = vld [vmem:[#allocation2 + $0x64] sm:$0xf0]  ;;  %v306_v14 = vld [vmem:[#allocation2 + $0x64] sm:$0xf] }
   0xa   :  { %v282_v15 = vld [vmem:[#allocation2 + $0x68] sm:$0xf0]  ;;  %v281_v16 = vor.u32 %v307_v13, %v280_v12  ;;  %v272_v18 = vld [vmem:[#allocation2 + $0x50] sm:$0xf]  ;;  %v305_v19 = vld [vmem:[#allocation2 + $0x54] sm:$0xf0] }
   0xb   :  { %173 = vmatpush.bf16.msra.mxu1 %v289_v10  ;;  %186 = vmatpush.bf16.msra.mxu2 %v293_v11  ;;  %v285_v17 = vor.u32 %v306_v14, %v282_v15  ;;  %v304_v20 = vld [vmem:[#allocation2 + $0x54] sm:$0xf]  ;;  %v274_v21 = vld [vmem:[#allocation2 + $0x58] sm:$0xf0]  ;;  %v52_v22 = vld [vmem:[%s408_s0] sm:$0xf]  ;;  %v273_v23 = vor.u32 %v305_v19, %v272_v18 }
   0xc   :  { %vm67_vm0 = vcmask 261120   ;;  %v277_v24 = vor.u32 %v304_v20, %v274_v21  ;;  %v264_v25 = vld [vmem:[#allocation2 + $0x40] sm:$0xf]  ;;  %v303_v26 = vld [vmem:[#allocation2 + $0x44] sm:$0xf0]  ;;  %s372_s23 = smov [#allocation5]  }
   0xd   :  { %78 = vmatpush.bf16.msra.mxu0 %v223_v9  ;;  %v302_v27 = vld [vmem:[#allocation2 + $0x44] sm:$0xf]  ;;  %v266_v28 = vld [vmem:[#allocation2 + $0x48] sm:$0xf0]  ;;  %v265_v29 = vor.u32 %v303_v26, %v264_v25  ;;  %v256_v31 = vld [vmem:[#allocation2 + $0x30] sm:$0xf] }
   0xe   :  { %v269_v30 = vor.u32 %v302_v27, %v266_v28  ;;  %v301_v32 = vld [vmem:[#allocation2 + $0x34] sm:$0xf0]  ;;  %v300_v33 = vld [vmem:[#allocation2 + $0x34] sm:$0xf]  ;;  %v258_v34 = vld [vmem:[#allocation2 + $0x38] sm:$0xf0] }
   0xf   :  { %174 = vmatpush.bf16.msra.mxu1 %v281_v16  ;;  %187 = vmatpush.bf16.msra.mxu2 %v285_v17  ;;  %v257_v35 = vor.u32 %v301_v32, %v256_v31  ;;  %v261_v36 = vor.u32 %v300_v33, %v258_v34  ;;  %v248_v37 = vld [vmem:[#allocation2 + $0x20] sm:$0xf]  ;;  %v299_v38 = vld [vmem:[#allocation2 + $0x24] sm:$0xf0]  ;;  %v298_v39 = vld [vmem:[#allocation2 + $0x24] sm:$0xf] }
  0x10   :  { %228 = vmatmul.msk.bf16.vlgmr.msra.gmra.mxu0 %vm67_vm0, %v52_v22  ;;  %v250_v40 = vld [vmem:[#allocation2 + $0x28] sm:$0xf0]  ;;  %v249_v41 = vor.u32 %v299_v38, %v248_v37  ;;  %v240_v43 = vld [vmem:[#allocation2 + $0x10] sm:$0xf]  ;;  %v297_v44 = vld [vmem:[#allocation2 + $0x14] sm:$0xf0] }
  0x11   :  { %v253_v42 = vor.u32 %v298_v39, %v250_v40  ;;  %v296_v45 = vld [vmem:[#allocation2 + $0x14] sm:$0xf]  ;;  %v241_v46 = vor.u32 %v297_v44, %v240_v43  ;;  %v242_v47 = vld [vmem:[#allocation2 + $0x18] sm:$0xf0]  ;;  %v232_v49 = vld [vmem:[#allocation2] sm:$0xf] }
  0x12   :  { %v245_v48 = vor.u32 %v296_v45, %v242_v47  ;;  %v295_v50 = vld [vmem:[#allocation2 + $0x4] sm:$0xf0]  ;;  %v294_v51 = vld [vmem:[#allocation2 + $0x4] sm:$0xf]  ;;  %v234_v53 = vld [vmem:[#allocation2 + $0x8] sm:$0xf0] }
  0x13   :  { %175 = vmatpush.bf16.msra.mxu1 %v273_v23  ;;  %188 = vmatpush.bf16.msra.mxu2 %v277_v24  ;;  %v233_v52 = vor.u32 %v295_v50, %v232_v49  ;;  %v237_v54 = vor.u32 %v294_v51, %v234_v53  ;;  %v316_v55 = vld [vmem:[%s410_s2] ss:$0 sm:$0xff]  ;;  %v229_v61 = vld [vmem:[%s410_s2 + $0x1] ss:$2 sm:$0x3]  ;;  %s208_s24 = sshll.u32 %s372_s23, 4  ;;  %s209_s24 = int_to_ptr.vmem [resolvable:$true] %s208_s24 }
  0x14   :  { %v89_v62 = vperm.slane %v229_v61, 0  ;;  %v90_v2 = vperm.slane %v229_v61, 1  ;;  %s210_s27 = sshll.u32 %s411_s3, 4  ;;  %s211_s27 = int_to_ptr.hbm [resolvable:$true] %s210_s27 }
  0x17   :  { %176 = vmatpush.bf16.msra.mxu1 %v265_v29  ;;  %189 = vmatpush.bf16.msra.mxu2 %v269_v30 }
  0x1b   :  { %177 = vmatpush.bf16.msra.mxu1 %v257_v35  ;;  %190 = vmatpush.bf16.msra.mxu2 %v261_v36 }
  0x1f   :  { %178 = vmatpush.bf16.msra.mxu1 %v249_v41  ;;  %191 = vmatpush.bf16.msra.mxu2 %v253_v42 }
  0x23   :  { %179 = vmatpush.bf16.msra.mxu1 %v241_v46  ;;  %192 = vmatpush.bf16.msra.mxu2 %v245_v48 }
  0x27   :  { %180 = vmatpush.bf16.msra.mxu1 %v233_v52  ;;  %193 = vmatpush.bf16.msra.mxu2 %v237_v54 }
  0x8d   :  { %v80_v56 = vpop.f32.mrf.mxu0 }
  0x8e   :  { %v81_v57 = vadd.f32 %v316_v55, %v80_v56 }
  0x90   :  { %v84_v58 = vmax.f32 %v81_v57, 0.0 }
  0x92   :  { %v85_v59 = vpack.c.bf16 %v84_v58, %v84_v58 }
  0x94   :  { %181 = vmatmul.bf16.vlgmr.msra.gmra.mxu1 %v85_v59  ;;  %194 = vmatmul.bf16.vlgmr.msra.gmra.mxu2 %v85_v59 }
  0x95   :  { %v82_v60 = vpop.f32.mrf.mxu0 }
 0x111   :  { %v182_v63 = vpop.f32.mrf.mxu1 }
 0x112   :  { %v183_v0 = vadd.f32 %v182_v63, %v89_v62 }
 0x114   :  { %v199_v1 = vmax.f32 %v183_v0, 0.0 }
 0x116   :  { %201 = vst [vmem:[#allocation5] sm:$0xff] %v199_v1 }
 0x117   :  { %v195_v3 = vpop.f32.mrf.mxu2 }
 0x118   :  { %v196_v4 = vadd.f32 %v195_v3, %v90_v2 }
 0x119   :  { %v184_v5 = vpop.f32.mrf.mxu1 }
 0x11a   :  { %v200_v6 = vmax.f32 %v196_v4, 0.0 }
 0x11c   :  { %202 = vst [vmem:[#allocation5 + $0x8] sm:$0xff] %v200_v6 }
 0x11d   :  { %213 = dma.vmem_to_hbm [thread:$0]  %s209_s24, 256, %s211_s27, [#allocation4]  }
 0x11f   :  { %v197_v7 = vpop.f32.mrf.mxu2 }
 0x120   :  { %367 = dma.done.wait [#allocation4], 256  }
 0x121   :  { %368 = vsyncadd [#allocation4], 4294967040 }
 0x122   :  { %218 = vsyncpa [#allocation3], 1 }
 0x123   :  { %219 = vsyncpa [#allocation4], 1 }

</bundles_post_ra>
